<compile_context>
chip_gen: v5e
topology: v5e:2x2
jax: 0.10.0
libtpu: 0.0.40
codegen_flags: <defaults>
</compile_context>

<pallas_src>
import functools

import jax
import jax.numpy as jnp
from jax import lax
from jax.experimental import pallas as pl
from jax.experimental.pallas import tpu as pltpu


# --------------------------------------------------------------------------
# Kernel
# --------------------------------------------------------------------------
def _fisher_td_kernel(x_ref, c_ref, lab_ref,
                      intra_ref, inter_ref,
                      cn_ref, ids_ref, ones_ref, acc_ref,
                      *, batch_size, tiles_total):
    split = pl.program_id(0)               # "parallel" axis (megacore split)
    t = pl.program_id(1)                   # "arbitrary" reduction over batch tiles
    tiles_per_split = pl.num_programs(1)
    t_last = tiles_per_split - 1
    TB, D = x_ref.shape
    C = c_ref.shape[0]

    # ---- first step of this split: hoist centers-only / constant work ----
    @pl.when(t == 0)
    def _init():
        cf32 = c_ref[...].astype(jnp.float32)
        cn_ref[...] = jnp.sum(cf32 * cf32, axis=1, keepdims=True)      # (C, 1)
        ids_ref[...] = lax.broadcasted_iota(jnp.int32, (C, 1), 0)      # (C, 1)
        ones_ref[...] = jnp.ones(ones_ref.shape, ones_ref.dtype)       # (1, D)
        acc_ref[0] = jnp.float32(0.0)

    # ---- MXU: (C, TB) scores, centers consumed in natural (C, D) layout ----
    xc_t = lax.dot_general(
        c_ref[...], x_ref[...],
        dimension_numbers=(((1,), (1,)), ((), ())),
        preferred_element_type=jnp.float32)                            # (C, TB)

    # per-sample ||x_i||^2, lane-major, via a ones-row matmul (f32 accumulate,
    # no full-tile f32 upcast of x)
    xv = x_ref[...]
    xn = lax.dot_general(
        ones_ref[...], xv * xv,
        dimension_numbers=(((1,), (1,)), ((), ())),
        preferred_element_type=jnp.float32)                            # (1, TB)

    lab = lab_ref[...]                                                 # (1, TB) i32
    mask = ids_ref[...] == lab                                         # (C, TB)

    # fused masked selection of (||c_y||^2 - 2 x.c_y) for the true class
    sel = jnp.sum(jnp.where(mask, cn_ref[...] - 2.0 * xc_t, 0.0),
                  axis=0, keepdims=True)                               # (1, TB)
    d = jnp.clip(xn + sel, 1e-12, 1e12)                                # (1, TB)

    # mask padded rows (ragged last tile / clamped duplicate tile) and
    # out-of-range labels.
    gt = split * tiles_per_split + t                                   # global tile id
    row_ids = gt * TB + lax.broadcasted_iota(jnp.int32, (1, TB), 1)
    valid = ((row_ids < batch_size) & (gt < tiles_total)
             & (lab >= 0) & (lab < C))
    acc_ref[0] += jnp.sum(jnp.where(valid, d, 0.0))

    # ---- last step of this split: inter loss + per-split partial outputs ----
    @pl.when(t == t_last)
    def _finalize():
        cf32 = c_ref[...].astype(jnp.float32)
        gc = jnp.mean(cf32, axis=0, keepdims=True)                     # (1, D)
        diff = cf32 - gc
        inter = jnp.sum(diff * diff)
        intra_ref[...] = jnp.broadcast_to(acc_ref[0], intra_ref.shape)
        inter_ref[...] = jnp.broadcast_to(inter, inter_ref.shape)


# --------------------------------------------------------------------------
# Tile sizing (bytes-based, generation-aware)
# --------------------------------------------------------------------------
def _round_up(x, m):
    return ((x + m - 1) // m) * m


def _round_down(x, m):
    return (x // m) * m


def _physical_vmem_bytes():
    """Physical VMEM of the current TPU generation (fallback: 64 MiB, the
    most conservative value across v5e/v6e/v7x)."""
    default = 64 * 1024 * 1024
    try:
        get_info = getattr(pltpu, "get_tpu_info", None)
        if get_info is None:
            return default
        info = get_info()
        v = getattr(info, "vmem_capacity_bytes", None)
        if not v or int(v) <= 0:
            return default
        return int(v)
    except Exception:
        return default


def _choose_batch_tile(B, D, C, x_itemsize, c_itemsize, vmem_bytes):
    """Pick the batch tile TB from a byte budget.

    Working set per grid step:
      2 * TB * D * x_itemsize      (double-buffered x tile)
      2 * C  * D * c_itemsize      (resident centers, double-buffered)
      ~3-4 (C, TB) f32 temporaries (scores / mask-select)
      small (1, TB) / (C, 1) temps and scratch
    The total is kept well under the physical VMEM of the generation, and each
    x buffer is additionally capped at ~8 MiB (HBM roofline plateau)."""
    c_pad = _round_up(max(C, 8), 8)
    budget = min(vmem_bytes * 3 // 8, 40 * 1024 * 1024)      # total working-set budget
    fixed = 2 * c_pad * D * c_itemsize + 2 * 1024 * 1024     # centers + slack
    per_row = 2 * D * x_itemsize + 4 * c_pad * 4 + 512       # x (x2), (C,TB) temps, misc
    avail = max(budget - fixed, 2 * 1024 * 1024)
    tb = avail // per_row
    # cap each x buffer at ~8 MiB (measured roofline plateau)
    tb = min(tb, (8 * 1024 * 1024) // max(D * x_itemsize, 1))
    tb = max(_round_down(tb, 128), 128)
    if tb >= B:
        return B                    # single tile; block == full array is always legal
    return int(tb)


# --------------------------------------------------------------------------
# Wrapper
# --------------------------------------------------------------------------
def fisher_td(x, labels, centers,
              intra_loss_weight=1.0, inter_loss_weight=0.0, batch_tile=None):
    """Returns (loss, intra_loss, inter_loss, None), mirroring
    FisherTD.forward(..., inter_class='global')."""
    B, D = x.shape
    C, _ = centers.shape
    labels_row = labels.astype(jnp.int32).reshape(1, B)

    vmem_bytes = _physical_vmem_bytes()

    if batch_tile is None:
        TB = _choose_batch_tile(B, D, C, x.dtype.itemsize,
                                centers.dtype.itemsize, vmem_bytes)
    else:
        TB = int(batch_tile)
        if TB >= B:
            TB = B
        elif TB % 128 != 0:
            raise ValueError("batch_tile must be a multiple of 128 when it tiles B")
    if TB >= B:
        TB = B

    n_tiles = pl.cdiv(B, TB)
    # Megacore split: a 2-wide "parallel" leading axis uses both v7x
    # TensorCores; on single-core chips it just iterates (negligible cost).
    n_split = 2 if n_tiles >= 2 else 1
    tiles_per_split = pl.cdiv(n_tiles, n_split)

    def x_map(s, t, _nt=n_tiles, _tps=tiles_per_split):
        return (jnp.minimum(s * _tps + t, _nt - 1), 0)

    def lab_map(s, t, _nt=n_tiles, _tps=tiles_per_split):
        return (0, jnp.minimum(s * _tps + t, _nt - 1))

    def c_map(s, t):
        return (0, 0)

    kernel = functools.partial(_fisher_td_kernel,
                               batch_size=B, tiles_total=n_tiles)

    part_shape = jax.ShapeDtypeStruct((n_split, 8, 128), jnp.float32)
    part_spec = pl.BlockSpec((1, 8, 128), lambda s, t: (s, 0, 0))

    vmem_limit = int(min(vmem_bytes * 3 // 4, 96 * 1024 * 1024))

    flops = 2 * B * C * D + 4 * B * D + 3 * B * C + 4 * C * D
    bytes_accessed = (B * D * x.dtype.itemsize
                      + C * D * centers.dtype.itemsize + B * 4)

    intra_part, inter_part = pl.pallas_call(
        kernel,
        out_shape=(part_shape, part_shape),
        grid=(n_split, tiles_per_split),
        in_specs=[
            pl.BlockSpec((TB, D), x_map),     # x tile, double-buffered DMA
            pl.BlockSpec((C, D), c_map),      # centers, resident
            pl.BlockSpec((1, TB), lab_map),   # labels tile, lane-major
        ],
        out_specs=(part_spec, part_spec),
        scratch_shapes=[
            pltpu.VMEM((C, 1), jnp.float32),  # hoisted ||c_j||^2
            pltpu.VMEM((C, 1), jnp.int32),    # hoisted class-id column
            pltpu.VMEM((1, D), x.dtype),      # hoisted ones row for ||x||^2
            pltpu.SMEM((1,), jnp.float32),    # per-core running intra sum
        ],
        compiler_params=pltpu.CompilerParams(
            dimension_semantics=("parallel", "arbitrary"),
            vmem_limit_bytes=vmem_limit,
        ),
        cost_estimate=pl.CostEstimate(
            flops=flops, transcendentals=0, bytes_accessed=bytes_accessed),
    )(x, centers, labels_row)

    intra = jnp.sum(intra_part[:, 0, 0])
    inter = inter_part[0, 0, 0]
    loss = intra_loss_weight * intra - inter_loss_weight * inter
    return loss, intra, inter, None


# --------------------------------------------------------------------------
# Pure-JAX reference (mirrors the PyTorch forward)
# --------------------------------------------------------------------------
def fisher_td_ref(x, labels, centers,
                  intra_loss_weight=1.0, inter_loss_weight=0.0):
    C = centers.shape[0]
    xn = jnp.sum(x ** 2, axis=1, keepdims=True)
    cn = jnp.sum(centers ** 2, axis=1, keepdims=True)
    distmat = xn + cn.T - 2.0 * (x @ centers.T)
    mask = labels[:, None] == jnp.arange(C)[None, :]
    intra = jnp.sum(jnp.where(mask, jnp.clip(distmat, 1e-12, 1e12), 0.0))
    gc = jnp.mean(centers, axis=0)
    inter = jnp.sum(jnp.sum((centers - gc) ** 2, axis=1))
    loss = intra_loss_weight * intra - inter_loss_weight * inter
    return loss, intra, inter, None


if __name__ == "__main__":
    num_classes = 10
    feat_dim = 32
    batch = 8

    key = jax.random.PRNGKey(0)
    k_x, k_c, k_l = jax.random.split(key, 3)

    centers = jax.random.normal(k_c, (num_classes, feat_dim), dtype=jnp.float32)
    x = jax.random.normal(k_x, (batch, feat_dim), dtype=jnp.float32)
    labels = jax.random.randint(k_l, (batch,), 0, num_classes, dtype=jnp.int32)

    loss, intra, inter, _ = fisher_td(x, labels, centers,
                                      intra_loss_weight=1.0, inter_loss_weight=0.5)
    jax.block_until_ready((loss, intra, inter))

    loss_r, intra_r, inter_r, _ = fisher_td_ref(x, labels, centers, 1.0, 0.5)
    assert jnp.allclose(loss, loss_r, rtol=1e-5, atol=1e-4), (loss, loss_r)
    assert jnp.allclose(intra, intra_r, rtol=1e-5, atol=1e-4), (intra, intra_r)
    assert jnp.allclose(inter, inter_r, rtol=1e-5, atol=1e-4), (inter, inter_r)

    # Exercise the tiled / megacore-split accumulation path with a ragged
    # last tile and a clamped duplicate tile (3 tiles split over 2 cores).
    b2, d2 = 300, 32
    k_x2, k_l2 = jax.random.split(k_x)
    x2 = jax.random.normal(k_x2, (b2, d2), dtype=jnp.float32)
    labels2 = jax.random.randint(k_l2, (b2,), 0, num_classes, dtype=jnp.int32)
    loss2, intra2, inter2, _ = fisher_td(x2, labels2, centers, 1.0, 0.25,
                                         batch_tile=128)
    jax.block_until_ready((loss2, intra2, inter2))

    loss2_r, intra2_r, inter2_r, _ = fisher_td_ref(x2, labels2, centers, 1.0, 0.25)
    assert jnp.allclose(loss2, loss2_r, rtol=1e-4, atol=1e-2), (loss2, loss2_r)
    assert jnp.allclose(intra2, intra2_r, rtol=1e-4, atol=1e-2), (intra2, intra2_r)
    assert jnp.allclose(inter2, inter2_r, rtol=1e-4, atol=1e-2), (inter2, inter2_r)

    print("KERNEL_OK")
</pallas_src>

<mosaic_0001>
module attributes {stable_mosaic.version = 11 : i64} {
  func.func @_fisher_td_kernel(%arg0: i32, %arg1: i32, %arg2: memref<8x32xf32, #tpu.memory_space<vmem>>, %arg3: memref<10x32xf32, #tpu.memory_space<vmem>>, %arg4: memref<1x8xi32, #tpu.memory_space<vmem>>, %arg5: memref<1x8x128xf32, #tpu.memory_space<vmem>>, %arg6: memref<1x8x128xf32, #tpu.memory_space<vmem>>, %arg7: memref<10x1xf32, #tpu.memory_space<vmem>>, %arg8: memref<10x1xi32, #tpu.memory_space<vmem>>, %arg9: memref<1x32xf32, #tpu.memory_space<vmem>>, %arg10: memref<1xf32, #tpu.memory_space<smem>>) attributes {dimension_semantics = [#tpu.dimension_semantics<parallel>, #tpu.dimension_semantics<arbitrary>], iteration_bounds = array<i64: 1, 1>, scalar_prefetch = 0 : i64, scratch_operands = 4 : i64, tpu.core_type = #tpu.core_type<tc>, window_params = [{transform_indices = @transform_0, window_bounds = array<i64: 8, 32>}, {pipeline_mode = #tpu.pipeline_mode<synchronous>, transform_indices = @transform_1, window_bounds = array<i64: 10, 32>}, {transform_indices = @transform_2, window_bounds = array<i64: 1, 8>}, {transform_indices = @transform_3, window_bounds = array<i64: 1, 8, 128>}, {transform_indices = @transform_4, window_bounds = array<i64: 1, 8, 128>}]} {
    %c0_i32 = arith.constant 0 : i32
    %0 = arith.cmpi eq, %arg1, %c0_i32 : i32
    %1 = arith.extui %0 : i1 to i32
    %c0_i32_0 = arith.constant 0 : i32
    %2 = arith.cmpi ne, %1, %c0_i32_0 : i32
    scf.if %2 {
      %c0_29 = arith.constant 0 : index
      %c0_30 = arith.constant 0 : index
      %58 = vector.load %arg3[%c0_29, %c0_30] : memref<10x32xf32, #tpu.memory_space<vmem>>, vector<10x32xf32>
      %59 = arith.mulf %58, %58 : vector<10x32xf32>
      %cst_31 = arith.constant dense<0.000000e+00> : vector<10xf32>
      %60 = vector.multi_reduction <add>, %59, %cst_31 [1] : vector<10x32xf32> to vector<10xf32>
      %61 = vector.shape_cast %60 : vector<10xf32> to vector<10x1xf32>
      %c0_32 = arith.constant 0 : index
      %c0_33 = arith.constant 0 : index
      %62 = vector.load %arg7[%c0_32, %c0_33] : memref<10x1xf32, #tpu.memory_space<vmem>>, vector<10x1xf32>
      tpu.vector_store %arg7[%c0_32, %c0_33], %61 {strides = array<i32>} : memref<10x1xf32, #tpu.memory_space<vmem>>, vector<10x1xf32>,
      %63 = tpu.iota {dimensions = array<i32: 0>} : vector<10x1xi32>
      %c0_34 = arith.constant 0 : index
      %c0_35 = arith.constant 0 : index
      %64 = vector.load %arg8[%c0_34, %c0_35] : memref<10x1xi32, #tpu.memory_space<vmem>>, vector<10x1xi32>
      tpu.vector_store %arg8[%c0_34, %c0_35], %63 {strides = array<i32>} : memref<10x1xi32, #tpu.memory_space<vmem>>, vector<10x1xi32>,
      %cst_36 = arith.constant 1.000000e+00 : f32
      %65 = vector.broadcast %cst_36 : f32 to vector<1x32xf32>
      %c0_37 = arith.constant 0 : index
      %c0_38 = arith.constant 0 : index
      %66 = vector.load %arg9[%c0_37, %c0_38] : memref<1x32xf32, #tpu.memory_space<vmem>>, vector<1x32xf32>
      tpu.vector_store %arg9[%c0_37, %c0_38], %65 {strides = array<i32>} : memref<1x32xf32, #tpu.memory_space<vmem>>, vector<1x32xf32>,
      %cst_39 = arith.constant 0.000000e+00 : f32
      %c0_40 = arith.constant 0 : index
      %67 = memref.load %arg10[%c0_40] : memref<1xf32, #tpu.memory_space<smem>>
      memref.store %cst_39, %arg10[%c0_40] : memref<1xf32, #tpu.memory_space<smem>>
    } else {
    }
    %c0 = arith.constant 0 : index
    %c0_1 = arith.constant 0 : index
    %3 = vector.load %arg3[%c0, %c0_1] : memref<10x32xf32, #tpu.memory_space<vmem>>, vector<10x32xf32>
    %c0_2 = arith.constant 0 : index
    %c0_3 = arith.constant 0 : index
    %4 = vector.load %arg2[%c0_2, %c0_3] : memref<8x32xf32, #tpu.memory_space<vmem>>, vector<8x32xf32>
    %cst = arith.constant dense<0.000000e+00> : vector<10x8xf32>
    %5 = tpu.matmul %3, %4, %cst {dimension_numbers = #tpu.dot_dimension_numbers<[1], [1], [0], [0], [0, 0, 1, 0], [], []>} : vector<10x32xf32>, vector<8x32xf32>, vector<10x8xf32> -> vector<10x8xf32>
    %c0_4 = arith.constant 0 : index
    %c0_5 = arith.constant 0 : index
    %6 = vector.load %arg2[%c0_4, %c0_5] : memref<8x32xf32, #tpu.memory_space<vmem>>, vector<8x32xf32>
    %c0_6 = arith.constant 0 : index
    %c0_7 = arith.constant 0 : index
    %7 = vector.load %arg9[%c0_6, %c0_7] : memref<1x32xf32, #tpu.memory_space<vmem>>, vector<1x32xf32>
    %8 = arith.mulf %6, %6 : vector<8x32xf32>
    %cst_8 = arith.constant dense<0.000000e+00> : vector<1x8xf32>
    %9 = tpu.matmul %7, %8, %cst_8 {dimension_numbers = #tpu.dot_dimension_numbers<[1], [1], [0], [0], [0, 0, 1, 0], [], []>} : vector<1x32xf32>, vector<8x32xf32>, vector<1x8xf32> -> vector<1x8xf32>
    %c0_9 = arith.constant 0 : index
    %c0_10 = arith.constant 0 : index
    %10 = vector.load %arg4[%c0_9, %c0_10] : memref<1x8xi32, #tpu.memory_space<vmem>>, vector<1x8xi32>
    %c0_11 = arith.constant 0 : index
    %c0_12 = arith.constant 0 : index
    %11 = vector.load %arg8[%c0_11, %c0_12] : memref<10x1xi32, #tpu.memory_space<vmem>>, vector<10x1xi32>
    %12 = vector.broadcast %11 : vector<10x1xi32> to vector<10x8xi32>
    %13 = vector.broadcast %10 : vector<1x8xi32> to vector<10x8xi32>
    %14 = arith.cmpi eq, %12, %13 : vector<10x8xi32>
    %c0_13 = arith.constant 0 : index
    %c0_14 = arith.constant 0 : index
    %15 = vector.load %arg7[%c0_13, %c0_14] : memref<10x1xf32, #tpu.memory_space<vmem>>, vector<10x1xf32>
    %cst_15 = arith.constant 2.000000e+00 : f32
    %16 = vector.broadcast %cst_15 : f32 to vector<10x8xf32>
    %17 = arith.mulf %16, %5 : vector<10x8xf32>
    %18 = vector.broadcast %15 : vector<10x1xf32> to vector<10x8xf32>
    %19 = arith.subf %18, %17 : vector<10x8xf32>
    %cst_16 = arith.constant 0.000000e+00 : f32
    %20 = vector.broadcast %cst_16 : f32 to vector<10x8xf32>
    %21 = arith.select %14, %19, %20 : vector<10x8xi1>, vector<10x8xf32>
    %cst_17 = arith.constant dense<0.000000e+00> : vector<8xf32>
    %22 = vector.multi_reduction <add>, %21, %cst_17 [0] : vector<10x8xf32> to vector<8xf32>
    %23 = vector.shape_cast %22 : vector<8xf32> to vector<1x8xf32>
    %24 = arith.addf %9, %23 : vector<1x8xf32>
    %cst_18 = arith.constant 9.99999996E-13 : f32
    %cst_19 = arith.constant 9.99999995E+11 : f32
    %25 = vector.broadcast %cst_18 : f32 to vector<1x8xf32>
    %26 = arith.maximumf %25, %24 : vector<1x8xf32>
    %27 = vector.broadcast %cst_19 : f32 to vector<1x8xf32>
    %28 = arith.minimumf %27, %26 : vector<1x8xf32>
    %c1_i32 = arith.constant 1 : i32
    %29 = arith.muli %arg0, %c1_i32 : i32
    %30 = arith.addi %29, %arg1 : i32
    %c8_i32 = arith.constant 8 : i32
    %31 = arith.muli %30, %c8_i32 : i32
    %32 = tpu.iota {dimensions = array<i32: 1>} : vector<1x8xi32>
    %33 = vector.broadcast %31 : i32 to vector<1x8xi32>
    %34 = arith.addi %33, %32 : vector<1x8xi32>
    %c8_i32_20 = arith.constant 8 : i32
    %35 = vector.broadcast %c8_i32_20 : i32 to vector<1x8xi32>
    %36 = arith.cmpi slt, %34, %35 : vector<1x8xi32>
    %c1_i32_21 = arith.constant 1 : i32
    %37 = arith.cmpi slt, %30, %c1_i32_21 : i32
    %38 = vector.broadcast %37 : i1 to vector<1x8xi1>
    %39 = arith.andi %36, %38 : vector<1x8xi1>
    %c0_i32_22 = arith.constant 0 : i32
    %40 = vector.broadcast %c0_i32_22 : i32 to vector<1x8xi32>
    %41 = arith.cmpi sge, %10, %40 : vector<1x8xi32>
    %42 = arith.andi %39, %41 : vector<1x8xi1>
    %c10_i32 = arith.constant 10 : i32
    %43 = vector.broadcast %c10_i32 : i32 to vector<1x8xi32>
    %44 = arith.cmpi slt, %10, %43 : vector<1x8xi32>
    %45 = arith.andi %42, %44 : vector<1x8xi1>
    %c0_23 = arith.constant 0 : index
    %46 = memref.load %arg10[%c0_23] : memref<1xf32, #tpu.memory_space<smem>>
    %cst_24 = arith.constant 0.000000e+00 : f32
    %47 = vector.broadcast %cst_24 : f32 to vector<1x8xf32>
    %48 = arith.select %45, %28, %47 : vector<1x8xi1>, vector<1x8xf32>
    %49 = vector.shape_cast %48 : vector<1x8xf32> to vector<1x1x8xf32>
    %cst_25 = arith.constant dense<0.000000e+00> : vector<1xf32>
    %50 = vector.multi_reduction <add>, %49, %cst_25 [1, 2] : vector<1x1x8xf32> to vector<1xf32>
    %51 = vector.shape_cast %50 : vector<1xf32> to vector<1x1x1xf32>
    %52 = vector.extract %51[0, 0, 0] : f32 from vector<1x1x1xf32>
    %53 = arith.addf %46, %52 : f32
    %c0_26 = arith.constant 0 : index
    %54 = memref.load %arg10[%c0_26] : memref<1xf32, #tpu.memory_space<smem>>
    memref.store %53, %arg10[%c0_26] : memref<1xf32, #tpu.memory_space<smem>>
    %c0_i32_27 = arith.constant 0 : i32
    %55 = arith.cmpi eq, %arg1, %c0_i32_27 : i32
    %56 = arith.extui %55 : i1 to i32
    %c0_i32_28 = arith.constant 0 : i32
    %57 = arith.cmpi ne, %56, %c0_i32_28 : i32
    scf.if %57 {
      %c0_29 = arith.constant 0 : index
      %c0_30 = arith.constant 0 : index
      %58 = vector.load %arg3[%c0_29, %c0_30] : memref<10x32xf32, #tpu.memory_space<vmem>>, vector<10x32xf32>
      %cst_31 = arith.constant dense<0.000000e+00> : vector<32xf32>
      %59 = vector.multi_reduction <add>, %58, %cst_31 [0] : vector<10x32xf32> to vector<32xf32>
      %60 = vector.shape_cast %59 : vector<32xf32> to vector<1x32xf32>
      %cst_32 = arith.constant 1.000000e+01 : f32
      %61 = vector.broadcast %cst_32 : f32 to vector<1x32xf32>
      %62 = arith.divf %60, %61 : vector<1x32xf32>
      %63 = vector.broadcast %62 : vector<1x32xf32> to vector<10x32xf32>
      %64 = arith.subf %58, %63 : vector<10x32xf32>
      %65 = arith.mulf %64, %64 : vector<10x32xf32>
      %66 = vector.shape_cast %65 : vector<10x32xf32> to vector<1x10x32xf32>
      %cst_33 = arith.constant dense<0.000000e+00> : vector<1xf32>
      %67 = vector.multi_reduction <add>, %66, %cst_33 [1, 2] : vector<1x10x32xf32> to vector<1xf32>
      %68 = vector.shape_cast %67 : vector<1xf32> to vector<1x1x1xf32>
      %69 = vector.extract %68[0, 0, 0] : f32 from vector<1x1x1xf32>
      %c0_34 = arith.constant 0 : index
      %70 = memref.load %arg10[%c0_34] : memref<1xf32, #tpu.memory_space<smem>>
      %71 = vector.broadcast %70 : f32 to vector<1x8x128xf32>
      %c0_35 = arith.constant 0 : index
      %c0_36 = arith.constant 0 : index
      %c0_37 = arith.constant 0 : index
      %72 = vector.load %arg5[%c0_35, %c0_36, %c0_37] : memref<1x8x128xf32, #tpu.memory_space<vmem>>, vector<1x8x128xf32>
      tpu.vector_store %arg5[%c0_35, %c0_36, %c0_37], %71 {strides = array<i32>} : memref<1x8x128xf32, #tpu.memory_space<vmem>>, vector<1x8x128xf32>,
      %73 = vector.broadcast %69 : f32 to vector<1x8x128xf32>
      %c0_38 = arith.constant 0 : index
      %c0_39 = arith.constant 0 : index
      %c0_40 = arith.constant 0 : index
      %74 = vector.load %arg6[%c0_38, %c0_39, %c0_40] : memref<1x8x128xf32, #tpu.memory_space<vmem>>, vector<1x8x128xf32>
      tpu.vector_store %arg6[%c0_38, %c0_39, %c0_40], %73 {strides = array<i32>} : memref<1x8x128xf32, #tpu.memory_space<vmem>>, vector<1x8x128xf32>,
    } else {
    }
    return
  }
  func.func @transform_0(%arg0: i32, %arg1: i32) -> (i32, i32) {
    %c1_i32 = arith.constant 1 : i32
    %0 = arith.muli %arg0, %c1_i32 : i32
    %1 = arith.addi %0, %arg1 : i32
    %c0_i32 = arith.constant 0 : i32
    %2 = arith.minsi %1, %c0_i32 : i32
    %c0_i32_0 = arith.constant 0 : i32
    %c0_i32_1 = arith.constant 0 : i32
    return %2, %c0_i32_0 : i32, i32
  }
  func.func @transform_1(%arg0: i32, %arg1: i32) -> (i32, i32) {
    %c0_i32 = arith.constant 0 : i32
    %c0_i32_0 = arith.constant 0 : i32
    %c0_i32_1 = arith.constant 0 : i32
    return %c0_i32, %c0_i32_0 : i32, i32
  }
  func.func @transform_2(%arg0: i32, %arg1: i32) -> (i32, i32) {
    %c1_i32 = arith.constant 1 : i32
    %0 = arith.muli %arg0, %c1_i32 : i32
    %1 = arith.addi %0, %arg1 : i32
    %c0_i32 = arith.constant 0 : i32
    %2 = arith.minsi %1, %c0_i32 : i32
    %c0_i32_0 = arith.constant 0 : i32
    %c0_i32_1 = arith.constant 0 : i32
    return %c0_i32_0, %2 : i32, i32
  }
  func.func @transform_3(%arg0: i32, %arg1: i32) -> (i32, i32, i32) {
    %c0_i32 = arith.constant 0 : i32
    %c0_i32_0 = arith.constant 0 : i32
    %c0_i32_1 = arith.constant 0 : i32
    return %arg0, %c0_i32, %c0_i32_0 : i32, i32, i32
  }
  func.func @transform_4(%arg0: i32, %arg1: i32) -> (i32, i32, i32) {
    %c0_i32 = arith.constant 0 : i32
    %c0_i32_0 = arith.constant 0 : i32
    %c0_i32_1 = arith.constant 0 : i32
    return %arg0, %c0_i32, %c0_i32_0 : i32, i32, i32
  }
}

</mosaic_0001>

<bundles_post_ra>
// kernel: tpu_custom_call.1
= control target key start
LH: loop header
LB: loop body
LE: loop exit
PB: predicated region body
PF: predicated region fallthrough
CT: control target
= control target key end

     0   :  { %10 = vsyncpa [#allocation7], 0  ;;  %s530_s0 = inlined_call_operand.hbm [shape: f32[8,32], index: 0, kind: input, shape index: {}]   ;;  %s531_s1 = inlined_call_operand.hbm [shape: f32[10,32], index: 1, kind: input, shape index: {}]   ;;  %s532_s2 = inlined_call_operand.vmem [shape: s32[1,8], index: 2, kind: input, shape index: {}]   ;;  %s533_s3 = inlined_call_operand.hbm [shape: f32[1,8,128], index: 3, kind: output, shape index: {0}]   ;;  %s534_s4 = inlined_call_operand.hbm [shape: f32[1,8,128], index: 4, kind: output, shape index: {1}]  }
   0x1   :  { %11 = vsyncpa [#allocation10], 0 }
   0x2   :  { %12 = vsyncpa [#allocation8], 0 }
   0x3   :  { %13 = vsyncpa [#allocation13], 0  ;;  %s24_s17 = sshll.u32 %s530_s0, 4  ;;  %s460_s18 = smov [#allocation6]   ;;  %s25_s17 = int_to_ptr.hbm [resolvable:$true] %s24_s17 }
   0x4   :  { %s26_s19 = sshll.u32 %s460_s18, 4  ;;  %s34_s22 = sshll.u32 %s531_s1, 4  ;;  %s27_s19 = int_to_ptr.vmem [resolvable:$true] %s26_s19  ;;  %s35_s22 = int_to_ptr.hbm [resolvable:$true] %s34_s22 }
   0x5   :  { %29 = dma.hbm_to_vmem [thread:$0]  %s25_s17, 128, %s27_s19, [#allocation7]  }
   0x6   :  { %s461_s23 = smov [#allocation9]   ;;  %s462_s25 = smov 128  }
   0x7   :  { %s36_s24 = sshll.u32 %s461_s23, 4  ;;  %s463_s26 = smov 8   ;;  %s37_s24 = int_to_ptr.vmem [resolvable:$true] %s36_s24 }
   0x8   :  { %42 = dma.hbm_to_vmem [thread:$0]  %s35_s22, 256, %s37_s24, [#allocation10], %s462_s25, %s462_s25, %s463_s26  }
   0x9   :  { %452 = dma.done.wait [#allocation7], 128  }
   0xa   :  { %453 = vsyncadd [#allocation7], 4294967168 }
   0xb   :  { %454 = dma.done.wait [#allocation10], 256  }
   0xc   :  { %455 = vsyncadd [#allocation10], 4294967040  ;;  %v100_v0 = vlaneseq  ;;  %vm96_vm0 = vcmask 7168   ;;  %v84_v2 = vld [vmem:[#allocation9] sm:$0xff]  ;;  %vm88_vm1 = vcmask 261120   ;;  %v111_v4 = vld [vmem:[#allocation6] sm:$0xff] }
   0xd   :  { %v86_v3 = vmul.f32 %v84_v2, %v84_v2  ;;  %v85_v5 = vld [vmem:[#allocation9 + $0x8] sm:$0x3]  ;;  %331 = vmatpush.xpose.msk.msra.mxu0 %vm88_vm1, %v111_v4  ;;  %336 = vmatpush.xpose.msk.msra.mxu2 %vm88_vm1, %v111_v4  ;;  %vm92_vm2 = vcmask 254976   ;;  %v464_v11 = vmov 0   ;;  %vm98_vm3 = vcmask 1024   ;;  %s299_s6 = sshll.u32 %s533_s3, 4  ;;  %s300_s6 = int_to_ptr.hbm [resolvable:$true] %s299_s6 }
   0xe   :  { %v101_v1 = vshrl.u32 %v100_v0, 7  ;;  %v110_v6 = vld [vmem:[#allocation9 + $0x8] sm:$0x3]  ;;  %v87_v8 = vmul.f32 %v85_v5, %v85_v5  ;;  %350 = vset.pattern.permute.xlu1 %v464_v11  ;;  %351 = vset.pattern.permute.xlu2 %v464_v11  ;;  %vm105_vm4 = vcmask 253952   ;;  %v465_v12 = vmov 1.0   ;;  %s468_s7 = smov [#allocation12]  }
   0xf   :  { %v89_v7 = vsel %vm88_vm1, %v86_v3, 0.0  ;;  %352 = vset.pattern.permute.xlu0 %v464_v11  ;;  %106 = vst.msk [vmem:[#allocation4] sm:$0x1] %vm105_vm4, %v465_v12  ;;  %v146_v13 = vmul.f32 %v111_v4, %v111_v4  ;;  %v252_v21 = vld [vmem:[#allocation9 + $0x8] sm:$0x3]  ;;  %v253_v22 = vsel %vm88_vm1, %v84_v2, 0.0 }
  0x10   :  { %103 = vst.msk [vmem:[#allocation3] sm:$0xff] %vm96_vm0, %v101_v1  ;;  %90 = vadd.xlane.f32.xlu0 %v89_v7  ;;  %332 = vmatmul.msk.f32.vlgmr.msra.gmra.mxu0 %vm88_vm1, %v84_v2  ;;  %v93_v9 = vsel %vm92_vm2, %v87_v8, 0.0  ;;  %v102_v10 = vadd.s32 8, %v101_v1  ;;  %v255_v23 = vsel %vm92_vm2, %v252_v21, 0.0  ;;  %v466_v27 = vmov 10.0   ;;  %s308_s8 = sshll.u32 %s468_s7, 4  ;;  %s309_s8 = int_to_ptr.vmem [resolvable:$true] %s308_s8 }
  0x11   :  { %333 = vmatmul.msk.f32.vlgmr.msra.gmra.mxu2 %vm88_vm1, %v110_v6  ;;  %334 = vmatpush.xpose.msk.msra.mxu1 %vm88_vm1, %v146_v13  ;;  %v256_v24 = vadd.f32 %v255_v23, %v253_v22  ;;  %354 = vrcp.f32 %v466_v27  ;;  %v353_v50 = vld [vmem:[%s532_s2] ss:$0 sm:$0xff]  ;;  %vm177_vm7 = vcmask 64512   ;;  %vm179_vm8 = vcmask 58368   ;;  %s310_s11 = sshll.u32 %s534_s4, 4  ;;  %s311_s11 = int_to_ptr.hbm [resolvable:$true] %s310_s11 }
  0x12   :  { %104 = vst.msk [vmem:[#allocation3 + $0x8] sm:$0x3] %vm98_vm3, %v102_v10  ;;  %v147_v3 = vld [vmem:[%s532_s2] sm:$0x1]  ;;  %vm234_vm15 = vcmask 57344   ;;  %s467_s2 = smov [#allocation11]  }
  0x13   :  { %v257_v25 = vrot.slane %v256_v24, 4  ;;  %vm228_vm11 = vcmp.ge.s32.totalorder %v147_v3, 0  ;;  %vm230_vm13 = vcmp.lt.s32.totalorder %v147_v3, 10  ;;  %s297_s29 = sshll.u32 %s467_s2, 4  ;;  %s298_s29 = int_to_ptr.vmem [resolvable:$true] %s297_s29 }
  0x15   :  { %v258_v26 = vadd.f32 %v257_v25, %v256_v24 }
  0x16   :  { %v145_v15 = vld [vmem:[#allocation4] sm:$0x1] }
  0x17   :  { %v148_v14 = vld [vmem:[#allocation3] sm:$0xff]  ;;  %335 = vmatmul.msk.f32.vlgmr.msra.gmra.mxu1 %vm88_vm1, %v145_v15  ;;  %v259_v28 = vrot.slane %v258_v26, 2  ;;  %v355_v29 = vpop.eup %354 }
  0x18   :  { %94 = vadd.xlane.f32.xlu0 %v93_v9  ;;  %151 = vperm.xlu2 %351, %v148_v14   ;;  %v264_v30 = vmul.f32 10.0, %v355_v29  ;;  %vm268_vm5 = vweird.f32 %v355_v29 }
  0x19   :  { %v149_v16 = vld [vmem:[#allocation3 + $0x8] sm:$0x3]  ;;  %v260_v31 = vadd.f32 %v259_v28, %v258_v26 }
  0x1a   :  { %v265_v32 = vsub.f32 1.0, %v264_v30 }
  0x1b   :  { %v261_v34 = vrot.slane %v260_v31, 1 }
  0x1c   :  { %v266_v33 = vmul.f32 %v355_v29, %v265_v32 }
  0x1d   :  { %v262_v36 = vadd.f32 %v261_v34, %v260_v31 }
  0x1e   :  { %v267_v35 = vadd.f32 %v355_v29, %v266_v33 }
  0x20   :  { %154 = vperm.xlu2 %351, %v149_v16   ;;  %v269_v37 = vsel %vm268_vm5, %v355_v29, %v267_v35 }
  0x21   :  { %v270_v38 = vmul.f32 %v269_v37, %v262_v36 }
  0x23   :  { %v271_v39 = vsub.f32 %v84_v2, %v270_v38  ;;  %v272_v40 = vsub.f32 %v252_v21, %v270_v38  ;;  %v219_v2 = vand.u32 127, %v100_v0 }
  0x25   :  { %v273_v41 = vmul.f32 %v271_v39, %v271_v39  ;;  %v274_v42 = vmul.f32 %v272_v40, %v272_v40  ;;  %vm222_vm10 = vcmp.lt.s32.totalorder %v219_v2, 8 }
  0x26   :  { %vm229_vm12 = vmand %vm222_vm10, %vm228_vm11 }
  0x27   :  { %v275_v43 = vsel %vm88_vm1, %v273_v41, 0.0  ;;  %v276_v44 = vsel %vm92_vm2, %v274_v42, 0.0  ;;  %vm231_vm14 = vmand %vm229_vm12, %vm230_vm13 }
  0x28   :  { %v277_v45 = vadd.f32 %v276_v44, %v275_v43 }
  0x72   :  { %v152_v46 = vpop.permute.xlu2 %151 }
  0x73   :  { %vm157_vm6 = vcmp.eq.s32.totalorder %v152_v46, %v353_v50 }
  0x7a   :  { %v155_v54 = vpop.permute.xlu2 %154 }
  0x7b   :  { %vm158_vm9 = vcmp.eq.s32.totalorder %v155_v54, %v353_v50 }
  0x83   :  { %v91_v17 = vpop.xlane.xlu0 %90 }
  0x84   :  { %97 = vst.msk [vmem:[#allocation2] sm:$0xff] %vm96_vm0, %v91_v17 }
  0x8b   :  { %v95_v18 = vpop.xlane.xlu0 %94  ;;  %v159_v19 = vld [vmem:[#allocation2] sm:$0xff] }
  0x8c   :  { %99 = vst.msk [vmem:[#allocation2 + $0x8] sm:$0x3] %vm98_vm3, %v95_v18  ;;  %165 = vperm.xlu1 %350, %v159_v19  }
  0x8d   :  { %v139_v47 = vpop.f32.mrf.mxu0 }
  0x8e   :  { %v161_v49 = vmul.f32 2.0, %v139_v47 }
  0x93   :  { %v160_v20 = vld [vmem:[#allocation2 + $0x8] sm:$0x3] }
  0x94   :  { %170 = vperm.xlu1 %350, %v160_v20   ;;  %v142_v51 = vpop.f32.mrf.mxu2  ;;  %v211_v6 = vpop.f32.mrf.mxu1 }
  0x95   :  { %v162_v53 = vmul.f32 2.0, %v142_v51 }
  0xbe   :  { %278 = vadd.xlane.f32.xlu1 %v277_v45 }
  0xfe   :  { %v166_v48 = vpop.permute.xlu1 %165 }
  0xff   :  { %v173_v52 = vsub.f32 %v166_v48, %v161_v49 }
 0x101   :  { %v175_v56 = vsel %vm157_vm6, %v173_v52, 0.0 }
 0x102   :  { %v178_v59 = vsel %vm177_vm7, %v175_v56, 0.0 }
 0x106   :  { %v171_v55 = vpop.permute.xlu1 %170 }
 0x107   :  { %v174_v57 = vsub.f32 %v171_v55, %v162_v53 }
 0x109   :  { %v176_v58 = vsel %vm158_vm9, %v174_v57, 0.0 }
 0x10a   :  { %v180_v60 = vsel %vm179_vm8, %v176_v58, 0.0 }
 0x10b   :  { %v181_v61 = vadd.f32 %v180_v60, %v178_v59 }
 0x10d   :  { %v182_v62 = vrot.slane %v181_v61, 4 }
 0x10f   :  { %v183_v63 = vadd.f32 %v182_v62, %v181_v61 }
 0x111   :  { %v184_v1 = vrot.slane %v183_v63, 2 }
 0x113   :  { %v185_v4 = vadd.f32 %v184_v1, %v183_v63 }
 0x115   :  { %v186_v5 = vrot.slane %v185_v4, 1 }
 0x117   :  { %v187_v7 = vadd.f32 %v186_v5, %v185_v4 }
 0x119   :  { %v212_v8 = vadd.f32 %v211_v6, %v187_v7 }
 0x11b   :  { %v214_v9 = vmax.f32 %v212_v8, 1e-12 }
 0x11d   :  { %v215_v10 = vmin.f32 %v214_v9, 1e+12 }
 0x11f   :  { %v233_v11 = vsel %vm231_vm14, %v215_v10, 0.0 }
 0x120   :  { %v235_v12 = vsel %vm234_vm15, %v233_v11, 0.0 }
 0x121   :  { %236 = vadd.xlane.f32.xlu0 %v235_v12 }
 0x131   :  { %v279_v0 = vpop.xlane.xlu1 %278 }
 0x132   :  { %v280_v13 = vrot.slane %v279_v0, 4 }
 0x134   :  { %v281_v14 = vadd.f32 %v280_v13, %v279_v0 }
 0x136   :  { %v282_v15 = vrot.slane %v281_v14, 2 }
 0x138   :  { %v283_v19 = vadd.f32 %v282_v15, %v281_v14 }
 0x13a   :  { %v284_v22 = vrot.slane %v283_v19, 1 }
 0x13c   :  { %v285_v25 = vadd.f32 %v284_v22, %v283_v19 }
 0x194   :  { %v237_v16 = vpop.xlane.xlu0 %236 }
 0x195   :  { %v238_v17 = vrot.slane %v237_v16, 4 }
 0x197   :  { %v239_v18 = vadd.f32 %v238_v17, %v237_v16 }
 0x199   :  { %v240_v20 = vrot.slane %v239_v18, 2 }
 0x19b   :  { %v241_v21 = vadd.f32 %v240_v20, %v239_v18 }
 0x19d   :  { %v242_v23 = vrot.slane %v241_v21, 1 }
 0x19f   :  { %v243_v24 = vadd.f32 %v242_v23, %v241_v21 }
 0x1a1   :  { %337 = vpush %v243_v24 }
 0x1a2   :  { %339 = vpush %v285_v25 }
 0x1d2   :  { %s338_s12 = spop %337 }
 0x1d3   :  { %v288_v26 = vstv %s338_s12  ;;  %s340_s13 = spop %339 }
 0x1d4   :  { %289 = vst [vmem:[#allocation11] sm:$0xff] %v288_v26  ;;  %v290_v27 = vstv %s340_s13 }
 0x1d5   :  { %291 = vst [vmem:[#allocation12] sm:$0xff] %v290_v27  ;;  %302 = dma.vmem_to_hbm [thread:$0]  %s298_s29, 128, %s300_s6, [#allocation8]  }
 0x1d6   :  { %313 = dma.vmem_to_hbm [thread:$0]  %s309_s8, 128, %s311_s11, [#allocation13]  }
 0x1d7   :  { %456 = dma.done.wait [#allocation8], 128  }
 0x1d8   :  { %457 = vsyncadd [#allocation8], 4294967168 }
 0x1d9   :  { %458 = dma.done.wait [#allocation13], 128  }
 0x1da   :  { %459 = vsyncadd [#allocation13], 4294967168 }
 0x1db   :  { %322 = vsyncpa [#allocation7], 1 }
 0x1dc   :  { %323 = vsyncpa [#allocation10], 1 }
 0x1dd   :  { %324 = vsyncpa [#allocation8], 1 }
 0x1de   :  { %325 = vsyncpa [#allocation13], 1 }

</bundles_post_ra>
